<compile_context>
chip_gen: v5e
topology: v5e:2x2
jax: 0.10.0
libtpu: 0.0.40
codegen_flags: <defaults>
</compile_context>

<pallas_src>
import functools
import math

import jax
import jax.numpy as jnp
from jax.experimental import pallas as pl
from jax.experimental.pallas import tpu as pltpu

_MIB = 1024 * 1024
_SINGLE_K_MAX = 2048  # K at/under this -> one full-extent K block (no reduction axis)

# Per-generation tile preferences + scoped-VMEM limits (arithmetic-intensity /
# ridge-point derived; see review).
_PRESETS = {
    "v5e": dict(tm=512, tn=512, tk=1024, vmem=32 * _MIB),
    "v6e": dict(tm=1024, tn=1024, tk=1024, vmem=64 * _MIB),
    "v7x": dict(tm=512, tn=1024, tk=1024, vmem=48 * _MIB),
    "other": dict(tm=512, tn=512, tk=1024, vmem=32 * _MIB),
}

_M_CANDIDATES = (1024, 768, 512, 384, 256, 128)   # multiples of 8
_N_CANDIDATES = (2048, 1024, 768, 512, 384, 256, 128)  # multiples of 128


def _round_up(x, m):
    return ((x + m - 1) // m) * m


@functools.lru_cache(maxsize=1)
def _tpu_generation():
    try:
        kind = jax.devices()[0].device_kind.lower()
    except Exception:
        return "other"
    if "v7" in kind:
        return "v7x"
    if "v6" in kind:
        return "v6e"
    if "v5e" in kind or "v5 lite" in kind or "v5lite" in kind:
        return "v5e"
    return "other"


@functools.lru_cache(maxsize=1)
def _preset():
    p = dict(_PRESETS[_tpu_generation()])
    # Prefer a hardware-derived VMEM ceiling when available, leaving headroom for
    # compiler-internal scratch; fall back to the per-generation preset.
    try:
        cap = int(getattr(pltpu.get_tpu_info(), "vmem_capacity_bytes"))
        p["vmem"] = min(p["vmem"], max(16 * _MIB, cap - 16 * _MIB))
    except Exception:
        pass
    return p


def _choose_tile(extent, pref, align, candidates):
    """Pick (tile, padded_extent) for one GEMM dimension.

    A single full-extent (but `align`-padded) block if it fits inside the preferred
    tile; otherwise the largest candidate tile that minimizes padding waste."""
    ext = _round_up(max(extent, 1), align)
    if ext <= pref:
        return ext, ext
    best_t, best_pad = None, None
    for c in candidates:  # largest -> smallest: ties go to the bigger tile
        if c > pref or c % align:
            continue
        pad = _round_up(ext, c)
        if best_pad is None or pad < best_pad:
            best_t, best_pad = c, pad
    return best_t, best_pad


def _choose_k(extent, pref):
    """K tiling: single full-extent block when small, otherwise minimal-waste tile."""
    ext = _round_up(max(extent, 1), 128)
    if ext <= _SINGLE_K_MAX:
        return ext, ext
    best_t, best_pad = None, None
    for c in (2048, 1024, 512):
        if c > max(pref, 512):
            continue
        pad = _round_up(ext, c)
        if best_pad is None or pad < best_pad:
            best_t, best_pad = c, pad
    return best_t, best_pad


# ------------------------------ kernels ------------------------------


def _rpl_matmul_kernel_ktiled(x_ref, wt_ref, b_ref, o_ref, acc_ref):
    # x_ref: (tm, tk), wt_ref: (tk, tn), b_ref: (1, tn) f32, o_ref: (tm, tn),
    # acc_ref: (tm, tn) f32 scratch, resident across the K grid axis.
    k = pl.program_id(2)

    @pl.when(k == 0)
    def _init():
        acc_ref[...] = jnp.zeros_like(acc_ref)

    acc_ref[...] += jnp.dot(x_ref[...], wt_ref[...],
                            preferred_element_type=jnp.float32)

    @pl.when(k == pl.num_programs(2) - 1)
    def _finalize():
        o_ref[...] = (acc_ref[...] + b_ref[...]).astype(o_ref.dtype)


def _rpl_matmul_kernel_single_k(x_ref, wt_ref, b_ref, o_ref):
    # Full K in one block: no accumulator scratch, no init/finalize phases.
    o_ref[...] = (jnp.dot(x_ref[...], wt_ref[...],
                          preferred_element_type=jnp.float32)
                  + b_ref[...]).astype(o_ref.dtype)


# ------------------------------ host-side wrapper ------------------------------


def prepare_row_parallel_params(weight, bias=None, *, compute_dtype=jnp.bfloat16):
    """One-time weight/bias preparation (call at init / checkpoint-load time,
    NOT inside the per-step forward).

    - transposes the PyTorch-layout (out_size, in_size) weight to (in_size, out_size)
      so the kernel runs a plain (M,K)x(K,N) MXU matmul with a lane-dense output,
    - casts the weight to the MXU operand dtype (bf16 by DEFAULT: half the HBM
      traffic and 3-4x MXU throughput; accumulation stays f32.  Pass
      compute_dtype=jnp.float32 for exact f32 semantics),
    - zero-pads K and N up to tile multiples; N is always padded to a multiple of
      128 so output stores are unmasked/lane-dense.
    """
    out_size, in_size = weight.shape
    pref = _preset()
    tn, n_pad = _choose_tile(out_size, pref["tn"], 128, _N_CANDIDATES)
    tk, k_pad = _choose_k(in_size, pref["tk"])

    w_t = weight.T.astype(compute_dtype)            # (K, N) — paid once, not per call
    if bias is None:
        bias = jnp.zeros((out_size,), dtype=jnp.float32)
    b2 = bias.astype(jnp.float32).reshape(1, out_size)

    if (k_pad, n_pad) != (in_size, out_size):
        w_t = jnp.pad(w_t, ((0, k_pad - in_size), (0, n_pad - out_size)))
        b2 = jnp.pad(b2, ((0, 0), (0, n_pad - out_size)))

    return {
        "w_t": w_t,                 # (K_pad, N_pad), compute dtype
        "bias": b2,                 # (1, N_pad), f32
        "in_features": in_size,
        "out_features": out_size,
        "tk": tk,
        "tn": tn,
    }


def row_parallel_linear(x, params):
    """RowParallelLinear forward (world_size == 1):  Y = X @ A^T + b.

    x: (..., in_features); returns (..., out_features) in x.dtype.
    Note: x is cast to the prepared weight's compute dtype (bf16 by default) for
    the MXU operands — an intentional precision trade-off; accumulation is f32.
    """
    in_size = params["in_features"]
    out_size = params["out_features"]
    w_t = params["w_t"]
    b2 = params["bias"]
    tk = params["tk"]
    tn = params["tn"]
    k_pad, n_pad = w_t.shape

    pref = _preset()
    gen = _tpu_generation()
    vmem_limit = pref["vmem"]

    lead = x.shape[:-1]
    x2 = x.reshape(-1, in_size)
    m = x2.shape[0]
    out_dtype = x.dtype

    # Adaptive M tile: minimize padded-M waste (e.g. M=300 -> tm=384, not 512).
    tm, m_pad = _choose_tile(m, pref["tm"], 8, _M_CANDIDATES)

    # v7x has 2 TensorCores: make sure the (parallel, parallel) grid has >= 2
    # blocks so both cores get work (only when the halved tile stays 128-aligned).
    if (gen == "v7x" and (m_pad // tm) * (n_pad // tn) < 2
            and tn >= 256 and (tn // 2) % 128 == 0):
        tn //= 2

    if x2.dtype != w_t.dtype:
        x2 = x2.astype(w_t.dtype)               # bf16 operands, f32 accumulation
    if (m_pad, k_pad) != (m, in_size):
        x2 = jnp.pad(x2, ((0, m_pad - m), (0, k_pad - in_size)))

    grid_k = k_pad // tk
    x_b = x2.dtype.itemsize
    w_b = w_t.dtype.itemsize
    o_b = jnp.dtype(out_dtype).itemsize

    # Safety net: shrink tiles if the double-buffered working set would overflow
    # the scoped-VMEM budget (practically never triggers with the presets above).
    def _vmem_est(tm_, tn_, tk_):
        b = (2 * tm_ * tk_ * x_b + 2 * tk_ * tn_ * w_b
             + 2 * tn_ * 4 + 2 * tm_ * tn_ * o_b)
        if grid_k > 1:
            b += tm_ * tn_ * 4
        return b

    while _vmem_est(tm, tn, tk) > int(0.75 * vmem_limit):
        if (tn >= max(tm, tk) and tn >= 256
                and (tn // 2) % 128 == 0 and n_pad % (tn // 2) == 0):
            tn //= 2
        elif (grid_k > 1 and tk >= tm and tk >= 256
              and (tk // 2) % 128 == 0 and k_pad % (tk // 2) == 0):
            tk //= 2
            grid_k = k_pad // tk
        elif tm >= 16 and (tm // 2) % 8 == 0 and m_pad % (tm // 2) == 0:
            tm //= 2
        else:
            break

    grid_m = m_pad // tm
    grid_n = n_pad // tn
    grid_k = k_pad // tk

    # Accurate HBM traffic for XLA's scheduler: X is re-read once per N block
    # column, W^T once per M block row; the output is written once.
    cost = pl.CostEstimate(
        flops=2 * m_pad * n_pad * k_pad,
        transcendentals=0,
        bytes_accessed=(m_pad * k_pad * x_b * grid_n
                        + k_pad * n_pad * w_b * grid_m
                        + n_pad * 4 * grid_m
                        + m_pad * n_pad * o_b),
    )
    out_shape = jax.ShapeDtypeStruct((m_pad, n_pad), out_dtype)

    if grid_k == 1:
        # Single full-extent K block: 2-D grid, no accumulator, no init/finalize.
        out = pl.pallas_call(
            _rpl_matmul_kernel_single_k,
            out_shape=out_shape,
            grid_spec=pltpu.PrefetchScalarGridSpec(
                num_scalar_prefetch=0,
                grid=(grid_m, grid_n),
                in_specs=[
                    pl.BlockSpec((tm, k_pad), lambda i, j: (i, 0)),   # X row-panel
                    pl.BlockSpec((k_pad, tn), lambda i, j: (0, j)),   # W^T col-panel
                    pl.BlockSpec((1, tn), lambda i, j: (0, j)),       # bias tile
                ],
                out_specs=pl.BlockSpec((tm, tn), lambda i, j: (i, j)),
            ),
            compiler_params=pltpu.CompilerParams(
                dimension_semantics=("parallel", "parallel"),
                vmem_limit_bytes=vmem_limit,
            ),
            cost_estimate=cost,
        )(x2, w_t, b2)
    else:
        # 3-axis grid with K last ("arbitrary"); f32 accumulator resident over K.
        # TODO(synk): if DMA is still exposed on v7x, sweep pl.Buffered(3) on the
        #             W^T BlockSpec (pipeline_mode=) — left at the default of 2.
        out = pl.pallas_call(
            _rpl_matmul_kernel_ktiled,
            out_shape=out_shape,
            grid_spec=pltpu.PrefetchScalarGridSpec(
                num_scalar_prefetch=0,
                grid=(grid_m, grid_n, grid_k),
                in_specs=[
                    pl.BlockSpec((tm, tk), lambda i, j, k: (i, k)),    # X tile
                    pl.BlockSpec((tk, tn), lambda i, j, k: (k, j)),    # W^T tile
                    pl.BlockSpec((1, tn), lambda i, j, k: (0, j)),     # bias tile
                ],
                out_specs=pl.BlockSpec((tm, tn), lambda i, j, k: (i, j)),
                scratch_shapes=[pltpu.VMEM((tm, tn), jnp.float32)],
            ),
            compiler_params=pltpu.CompilerParams(
                dimension_semantics=("parallel", "parallel", "arbitrary"),
                vmem_limit_bytes=vmem_limit,
            ),
            cost_estimate=cost,
        )(x2, w_t, b2)

    if (m_pad, n_pad) != (m, out_size):
        out = out[:m, :out_size]
    return out.reshape(*lead, out_size)


def init_row_parallel_linear_params(key, input_size, output_size, dtype=jnp.float32):
    """Deterministic parameter init matching the module's __init__:
    xavier_normal_ on the (output_size, input_size) weight, zero bias."""
    std = math.sqrt(2.0 / (input_size + output_size))
    weight = std * jax.random.normal(key, (output_size, input_size), dtype=dtype)
    bias = jnp.zeros((output_size,), dtype=dtype)
    return weight, bias


if __name__ == "__main__":
    key = jax.random.PRNGKey(0)
    k_w, k_x, k_wb, k_xb = jax.random.split(key, 4)

    # --- Case 1: module-sized small shapes, exact f32 path (semantics check) ---
    batch, seq = 2, 8
    input_size, output_size = 32, 64
    weight, bias = init_row_parallel_linear_params(k_w, input_size, output_size)
    x = jax.random.normal(k_x, (batch, seq, input_size), dtype=jnp.float32)

    params_f32 = prepare_row_parallel_params(weight, bias, compute_dtype=jnp.float32)
    fwd = jax.jit(lambda xx: row_parallel_linear(xx, params_f32))
    y = jax.block_until_ready(fwd(x))

    y_ref = jnp.einsum("bsk,nk->bsn", x, weight,
                       precision=jax.lax.Precision.HIGHEST) + bias
    assert y.shape == (batch, seq, output_size)
    assert jnp.allclose(y, y_ref, atol=1e-5, rtol=1e-5), "f32 small-case mismatch"

    # --- Case 2: default bf16 MXU-operand path (f32 accumulation) ---
    params_bf16 = prepare_row_parallel_params(weight, bias)       # bf16 by default
    y_bf16 = jax.block_until_ready(row_parallel_linear(x, params_bf16))
    assert y_bf16.shape == (batch, seq, output_size)
    assert jnp.allclose(y_bf16, y_ref, atol=3e-2, rtol=3e-2), "bf16 case mismatch"

    # --- Case 3: multi-block grid exercising the K-reduction accumulator path
    #             (K > 2048 -> tiled K; N padded to a 128-multiple) ---
    batch_b, seq_b = 2, 24
    in_b, out_b = 2304, 384
    weight_b, bias_b = init_row_parallel_linear_params(k_wb, in_b, out_b)
    x_b = jax.random.normal(k_xb, (batch_b, seq_b, in_b), dtype=jnp.float32)

    params_b = prepare_row_parallel_params(weight_b, bias_b, compute_dtype=jnp.float32)
    y_b = jax.block_until_ready(row_parallel_linear(x_b, params_b))
    y_b_ref = jnp.einsum("bsk,nk->bsn", x_b, weight_b,
                         precision=jax.lax.Precision.HIGHEST) + bias_b
    assert y_b.shape == (batch_b, seq_b, out_b)
    assert jnp.allclose(y_b, y_b_ref, atol=1e-3, rtol=1e-3), "tiled-K f32 case mismatch"

    print("KERNEL_OK")
</pallas_src>

<mosaic_0001>
module attributes {stable_mosaic.version = 11 : i64} {
  func.func @_rpl_matmul_kernel_single_k(%arg0: i32, %arg1: i32, %arg2: memref<16x128xf32, #tpu.memory_space<vmem>>, %arg3: memref<128x128xf32, #tpu.memory_space<vmem>>, %arg4: memref<1x128xf32, #tpu.memory_space<vmem>>, %arg5: memref<16x128xf32, #tpu.memory_space<vmem>>) attributes {dimension_semantics = [#tpu.dimension_semantics<parallel>, #tpu.dimension_semantics<parallel>], iteration_bounds = array<i64: 1, 1>, scalar_prefetch = 0 : i64, scratch_operands = 0 : i64, tpu.core_type = #tpu.core_type<tc>, window_params = [{transform_indices = @transform_0, window_bounds = array<i64: 16, 128>}, {transform_indices = @transform_1, window_bounds = array<i64: 128, 128>}, {transform_indices = @transform_2, window_bounds = array<i64: 1, 128>}, {transform_indices = @transform_3, window_bounds = array<i64: 16, 128>}]} {
    %c0 = arith.constant 0 : index
    %c0_0 = arith.constant 0 : index
    %0 = vector.load %arg2[%c0, %c0_0] : memref<16x128xf32, #tpu.memory_space<vmem>>, vector<16x128xf32>
    %c0_1 = arith.constant 0 : index
    %c0_2 = arith.constant 0 : index
    %1 = vector.load %arg3[%c0_1, %c0_2] : memref<128x128xf32, #tpu.memory_space<vmem>>, vector<128x128xf32>
    %cst = arith.constant dense<0.000000e+00> : vector<16x128xf32>
    %2 = tpu.matmul %0, %1, %cst {dimension_numbers = #tpu.dot_dimension_numbers<[1], [0], [0], [1], [0, 0, 1, 1], [], []>} : vector<16x128xf32>, vector<128x128xf32>, vector<16x128xf32> -> vector<16x128xf32>
    %c0_3 = arith.constant 0 : index
    %c0_4 = arith.constant 0 : index
    %3 = vector.load %arg4[%c0_3, %c0_4] : memref<1x128xf32, #tpu.memory_space<vmem>>, vector<1x128xf32>
    %4 = vector.broadcast %3 : vector<1x128xf32> to vector<16x128xf32>
    %5 = arith.addf %2, %4 : vector<16x128xf32>
    %c0_5 = arith.constant 0 : index
    %c0_6 = arith.constant 0 : index
    %6 = vector.load %arg5[%c0_5, %c0_6] : memref<16x128xf32, #tpu.memory_space<vmem>>, vector<16x128xf32>
    tpu.vector_store %arg5[%c0_5, %c0_6], %5 {strides = array<i32>} : memref<16x128xf32, #tpu.memory_space<vmem>>, vector<16x128xf32>,
    return
  }
  func.func @transform_0(%arg0: i32, %arg1: i32) -> (i32, i32) {
    %c0_i32 = arith.constant 0 : i32
    %c0_i32_0 = arith.constant 0 : i32
    return %arg0, %c0_i32 : i32, i32
  }
  func.func @transform_1(%arg0: i32, %arg1: i32) -> (i32, i32) {
    %c0_i32 = arith.constant 0 : i32
    %c0_i32_0 = arith.constant 0 : i32
    return %c0_i32, %arg1 : i32, i32
  }
  func.func @transform_2(%arg0: i32, %arg1: i32) -> (i32, i32) {
    %c0_i32 = arith.constant 0 : i32
    %c0_i32_0 = arith.constant 0 : i32
    return %c0_i32, %arg1 : i32, i32
  }
  func.func @transform_3(%arg0: i32, %arg1: i32) -> (i32, i32) {
    %c0_i32 = arith.constant 0 : i32
    return %arg0, %arg1 : i32, i32
  }
}

</mosaic_0001>

<bundles_post_ra>
// kernel: _lambda_.1
= control target key start
LH: loop header
LB: loop body
LE: loop exit
PB: predicated region body
PF: predicated region fallthrough
CT: control target
= control target key end

     0   :  { %8 = vsyncpa [#allocation3], 0  ;;  %s128_s15 = smov [#allocation2]   ;;  %s129_s17 = smov 128   ;;  %s169_s0 = inlined_call_operand.vmem [shape: f32[16,128], index: 0, kind: input, shape index: {}]   ;;  %s170_s1 = inlined_call_operand.hbm [shape: f32[128,128], index: 1, kind: input, shape index: {}]   ;;  %s171_s2 = inlined_call_operand.vmem [shape: f32[1,128], index: 2, kind: input, shape index: {}]   ;;  %s172_s3 = inlined_call_operand.vmem [shape: f32[16,128], index: 3, kind: output, shape index: {}]  }
   0x1   :  { %s15_s14 = sshll.u32 %s170_s1, 4  ;;  %s17_s16 = sshll.u32 %s128_s15, 4  ;;  %s16_s14 = int_to_ptr.hbm [resolvable:$true] %s15_s14  ;;  %s18_s16 = int_to_ptr.vmem [resolvable:$true] %s17_s16 }
   0x2   :  { %s130_s18 = smov 8  }
   0x3   :  { %23 = dma.hbm_to_vmem [thread:$0]  %s16_s14, 2048, %s18_s16, [#allocation3], %s129_s17, %s129_s17, %s130_s18  }
   0x4   :  { %126 = dma.done.wait [#allocation3], 2048  }
   0x5   :  { %127 = vsyncadd [#allocation3], 4294965248  ;;  %v47_v0 = vld [vmem:[#allocation2 + $0x78] sm:$0xff]  ;;  %v46_v1 = vld [vmem:[#allocation2 + $0x70] sm:$0xff] }
   0x6   :  { %52 = vmatpush.msra.mxu0 %v47_v0  ;;  %82 = vmatpush.msra.mxu1 %v47_v0  ;;  %v45_v2 = vld [vmem:[#allocation2 + $0x68] sm:$0xff]  ;;  %v44_v3 = vld [vmem:[#allocation2 + $0x60] sm:$0xff]  ;;  %v43_v4 = vld [vmem:[#allocation2 + $0x58] sm:$0xff] }
   0x7   :  { %v42_v5 = vld [vmem:[#allocation2 + $0x50] sm:$0xff]  ;;  %v41_v6 = vld [vmem:[#allocation2 + $0x48] sm:$0xff]  ;;  %v40_v7 = vld [vmem:[#allocation2 + $0x40] sm:$0xff] }
   0x8   :  { %53 = vmatpush.msra.mxu0 %v46_v1  ;;  %83 = vmatpush.msra.mxu1 %v46_v1  ;;  %v39_v8 = vld [vmem:[#allocation2 + $0x38] sm:$0xff]  ;;  %v38_v9 = vld [vmem:[#allocation2 + $0x30] sm:$0xff]  ;;  %v37_v10 = vld [vmem:[#allocation2 + $0x28] sm:$0xff] }
   0x9   :  { %v36_v11 = vld [vmem:[#allocation2 + $0x20] sm:$0xff]  ;;  %v35_v12 = vld [vmem:[#allocation2 + $0x18] sm:$0xff]  ;;  %v34_v13 = vld [vmem:[#allocation2 + $0x10] sm:$0xff] }
   0xa   :  { %54 = vmatpush.msra.mxu0 %v45_v2  ;;  %84 = vmatpush.msra.mxu1 %v45_v2  ;;  %v33_v14 = vld [vmem:[#allocation2 + $0x8] sm:$0xff]  ;;  %v32_v15 = vld [vmem:[#allocation2] sm:$0xff] }
   0xb   :  { %v30_v16 = vld [vmem:[%s169_s0] sm:$0xff]  ;;  %v31_v17 = vld [vmem:[%s169_s0 + $0x8] sm:$0xff] }
   0xc   :  { %55 = vmatpush.msra.mxu0 %v44_v3  ;;  %85 = vmatpush.msra.mxu1 %v44_v3  ;;  %v101_v18 = vld [vmem:[%s171_s2] ss:$0 sm:$0xff] }
   0xe   :  { %56 = vmatpush.msra.mxu0 %v43_v4  ;;  %86 = vmatpush.msra.mxu1 %v43_v4 }
  0x10   :  { %57 = vmatpush.msra.mxu0 %v42_v5  ;;  %87 = vmatpush.msra.mxu1 %v42_v5 }
  0x12   :  { %58 = vmatpush.msra.mxu0 %v41_v6  ;;  %88 = vmatpush.msra.mxu1 %v41_v6 }
  0x14   :  { %59 = vmatpush.msra.mxu0 %v40_v7  ;;  %89 = vmatpush.msra.mxu1 %v40_v7 }
  0x16   :  { %60 = vmatpush.msra.mxu0 %v39_v8  ;;  %90 = vmatpush.msra.mxu1 %v39_v8 }
  0x18   :  { %61 = vmatpush.msra.mxu0 %v38_v9  ;;  %91 = vmatpush.msra.mxu1 %v38_v9 }
  0x1a   :  { %62 = vmatpush.msra.mxu0 %v37_v10  ;;  %92 = vmatpush.msra.mxu1 %v37_v10 }
  0x1c   :  { %63 = vmatpush.msra.mxu0 %v36_v11  ;;  %93 = vmatpush.msra.mxu1 %v36_v11 }
  0x1e   :  { %64 = vmatpush.msra.mxu0 %v35_v12  ;;  %94 = vmatpush.msra.mxu1 %v35_v12 }
  0x20   :  { %65 = vmatpush.msra.mxu0 %v34_v13  ;;  %95 = vmatpush.msra.mxu1 %v34_v13 }
  0x22   :  { %66 = vmatpush.msra.mxu0 %v33_v14  ;;  %96 = vmatpush.msra.mxu1 %v33_v14 }
  0x24   :  { %67 = vmatpush.msra.mxu0 %v32_v15  ;;  %97 = vmatpush.msra.mxu1 %v32_v15 }
  0x25   :  { %68 = vmatmul.f32.vlgmr.msra.gmra.mxu0 %v30_v16  ;;  %71 = vmatmul.f32.vlgmr.msra.gmra.mxu1 %v31_v17 }
  0xa2   :  { %v69_v19 = vpop.f32.mrf.mxu0  ;;  %v72_v20 = vpop.f32.mrf.mxu1 }
  0xa3   :  { %v70_v21 = vadd.f32 %v101_v18, %v69_v19  ;;  %v73_v22 = vadd.f32 %v101_v18, %v72_v20 }
  0xa5   :  { %75 = vst [vmem:[%s172_s3] sm:$0xff] %v70_v21 }
  0xa6   :  { %76 = vst [vmem:[%s172_s3 + $0x8] sm:$0xff] %v73_v22 }
  0xa7   :  { %81 = vsyncpa [#allocation3], 1 }

</bundles_post_ra>
